<compile_context>
chip_gen: v6e
topology: v6e:2x2x1
jax: 0.10.0
libtpu: 0.0.40
codegen_flags: <defaults>
</compile_context>

<pallas_src>
import jax
import jax.numpy as jnp
from jax.experimental import pallas as pl
from jax.experimental.pallas import tpu as pltpu

LANE = 128
SUBLANE = 8


def _round_up(x, m):
    return (x + m - 1) // m * m


def reaction_ffn_kernel(r_ref, p_ref, w1_ref, b1_ref, w2_ref, b2_ref,
                        w3_ref, b3_ref, o_ref):
    # encoder-output diff in f32 on the VPU (inputs arrive unpadded f32),
    # single cast to bf16 as the MXU operand; accumulation stays f32.
    diff = (p_ref[...] - r_ref[...]).astype(jnp.bfloat16)
    # FFN (eval): dropout = identity; Linear -> ReLU -> Linear -> ReLU -> Linear
    h1 = jnp.dot(diff, w1_ref[...], preferred_element_type=jnp.float32) + b1_ref[...]
    h1 = jnp.maximum(h1, 0.0).astype(jnp.bfloat16)
    h2 = jnp.dot(h1, w2_ref[...], preferred_element_type=jnp.float32) + b2_ref[...]
    h2 = jnp.maximum(h2, 0.0).astype(jnp.bfloat16)
    out = jnp.dot(h2, w3_ref[...], preferred_element_type=jnp.float32) + b3_ref[...]
    # W3/out are 128-lane padded for the MXU; store only the real task columns.
    t = o_ref.shape[-1]
    o_ref[...] = out[:, :t].astype(o_ref.dtype)


def reaction_model_forward(r_atom_features, p_atom_features, params, *, tile_n=1024):
    """diff = p - r ; FFN(diff) with 3 linear layers (ReLU between), eval-mode dropout."""
    w1, b1, w2, b2, w3, b3 = params
    n, h = r_atom_features.shape
    fh = w1.shape[1]
    t = w3.shape[1]

    fhp = _round_up(fh, LANE)   # FFN hidden lanes padded for MXU / lane-dense layout
    tp = _round_up(t, LANE)     # W3 output lanes padded; store sliced back to t

    # Row tile: large, multiple of 8 sublanes, but small enough that the grid has
    # >= ~4 steps so both v7x TensorCores get work under dimension_semantics.
    tile_n = max(SUBLANE, min(tile_n, _round_up(pl.cdiv(n, 4), SUBLANE)))
    grid_n = pl.cdiv(n, tile_n)

    def pad2(x, rows, cols, dtype):
        return jnp.pad(x, ((0, rows - x.shape[0]), (0, cols - x.shape[1]))).astype(dtype)

    # weights/biases: one-off tiny cast/pad; zero padding keeps the math exact
    w1p = pad2(w1, h, fhp, jnp.bfloat16)
    w2p = pad2(w2, fhp, fhp, jnp.bfloat16)
    w3p = pad2(w3, fhp, tp, jnp.bfloat16)
    b1p = pad2(b1, 1, fhp, jnp.float32)
    b2p = pad2(b2, 1, fhp, jnp.float32)
    b3p = pad2(b3, 1, tp, jnp.float32)

    # 3-deep buffering for activation tiles when the pipeline is long enough
    # (v6e DMA-exposed); degrades gracefully if this jax lacks pl.Buffered.
    act_buffers = 3 if grid_n >= 3 else None

    def spec(shape, index_map, buffers=None):
        if buffers is not None and hasattr(pl, "Buffered"):
            try:
                return pl.BlockSpec(shape, index_map, pipeline_mode=pl.Buffered(buffers))
            except TypeError:
                pass
        return pl.BlockSpec(shape, index_map)

    rows_map = lambda i: (i, 0)
    const_map = lambda i: (0, 0)

    in_specs = [
        spec((tile_n, h), rows_map, act_buffers),   # r tile (f32, unpadded lanes)
        spec((tile_n, h), rows_map, act_buffers),   # p tile
        spec((h, fhp), const_map),                  # W1 (VMEM-resident across grid)
        spec((1, fhp), const_map),                  # b1
        spec((fhp, fhp), const_map),                # W2
        spec((1, fhp), const_map),                  # b2
        spec((fhp, tp), const_map),                 # W3 (lane-padded for MXU)
        spec((1, tp), const_map),                   # b3
    ]
    # TODO(synk): on v7x, single-buffer the constant weight specs
    # (pipeline_mode=pl.Buffered(1)) to halve resident weight VMEM for large FFNs.

    flops = 2 * n * (h * fhp + fhp * fhp + fhp * tp)
    w_bytes = (h * fhp + fhp * fhp + fhp * tp) * 2          # bf16 weights
    b_bytes = (2 * fhp + tp) * 4                            # f32 biases
    bytes_accessed = 2 * n * h * 4 + w_bytes + b_bytes + n * t * 4

    # tight VMEM estimate (physical lane padding included), 48 MiB cap for v7x headroom
    in_bufs = act_buffers if act_buffers else 2
    hp_vmem = _round_up(h, LANE)
    vmem_needed = (2 * in_bufs * tile_n * hp_vmem * 4       # r/p f32 input tiles
                   + 2 * tile_n * tp * 4                    # output tiles
                   + 2 * (w_bytes + b_bytes)                # double-buffered weights/biases
                   + 3 * tile_n * fhp * 4)                  # f32/bf16 intermediates
    vmem_limit = int(min(48 * 1024 * 1024,
                         max(16 * 1024 * 1024, (vmem_needed * 3) // 2)))

    out = pl.pallas_call(
        reaction_ffn_kernel,
        out_shape=jax.ShapeDtypeStruct((n, t), jnp.float32),
        grid=(grid_n,),
        in_specs=in_specs,
        out_specs=pl.BlockSpec((tile_n, t), rows_map),
        compiler_params=pltpu.CompilerParams(
            dimension_semantics=("parallel",),
            vmem_limit_bytes=vmem_limit,
        ),
        cost_estimate=pl.CostEstimate(
            flops=flops, transcendentals=0, bytes_accessed=bytes_accessed),
    )(r_atom_features.astype(jnp.float32), p_atom_features.astype(jnp.float32),
      w1p, b1p, w2p, b2p, w3p, b3p)

    # TODO(synk): PyTorch's .squeeze(-1) returns shape (N,) when task_num == 1;
    # this wrapper keeps (N, task_num).
    return out


def make_params(key, hidden_size, ffn_hidden_size, task_num):
    """Deterministic FFN parameters (nn.Linear shapes, stored pre-transposed as (in, out))."""
    ks = jax.random.split(key, 6)
    scale = 0.1
    w1 = scale * jax.random.normal(ks[0], (hidden_size, ffn_hidden_size), jnp.float32)
    b1 = scale * jax.random.normal(ks[1], (1, ffn_hidden_size), jnp.float32)
    w2 = scale * jax.random.normal(ks[2], (ffn_hidden_size, ffn_hidden_size), jnp.float32)
    b2 = scale * jax.random.normal(ks[3], (1, ffn_hidden_size), jnp.float32)
    w3 = scale * jax.random.normal(ks[4], (ffn_hidden_size, task_num), jnp.float32)
    b3 = scale * jax.random.normal(ks[5], (1, task_num), jnp.float32)
    return (w1, b1, w2, b2, w3, b3)


if __name__ == "__main__":
    # small shapes: 8 "atoms/reactions", hidden=32 (stand-in for mpnn_diff_hidden_size=300),
    # ffn_hidden=32, task_num=2
    N, HID, FFN_HID, TASK_NUM = 8, 32, 32, 2

    key = jax.random.PRNGKey(0)
    k_r, k_p, k_w = jax.random.split(key, 3)
    r_atom_features = jax.random.normal(k_r, (N, HID), jnp.float32)
    p_atom_features = jax.random.normal(k_p, (N, HID), jnp.float32)
    params = make_params(k_w, HID, FFN_HID, TASK_NUM)

    out = reaction_model_forward(r_atom_features, p_atom_features, params)
    out = jax.block_until_ready(out)

    # plain-JAX reference mirroring the kernel's bf16-operand / f32-accumulate scheme
    w1, b1, w2, b2, w3, b3 = params
    bf = lambda x: x.astype(jnp.bfloat16)
    diff = p_atom_features - r_atom_features
    h1 = jnp.maximum(jnp.dot(bf(diff), bf(w1), preferred_element_type=jnp.float32) + b1, 0.0)
    h2 = jnp.maximum(jnp.dot(bf(h1), bf(w2), preferred_element_type=jnp.float32) + b2, 0.0)
    ref = jnp.dot(bf(h2), bf(w3), preferred_element_type=jnp.float32) + b3

    assert out.shape == (N, TASK_NUM)
    assert jnp.allclose(out, ref, atol=5e-3, rtol=5e-3), (
        f"max abs err {jnp.max(jnp.abs(out - ref))}")

    print("KERNEL_OK")
</pallas_src>

<mosaic_0001>
module attributes {stable_mosaic.version = 11 : i64} {
  func.func @reaction_ffn_kernel(%arg0: i32, %arg1: memref<8x32xf32, #tpu.memory_space<vmem>>, %arg2: memref<8x32xf32, #tpu.memory_space<vmem>>, %arg3: memref<32x128xbf16, #tpu.memory_space<vmem>>, %arg4: memref<1x128xf32, #tpu.memory_space<vmem>>, %arg5: memref<128x128xbf16, #tpu.memory_space<vmem>>, %arg6: memref<1x128xf32, #tpu.memory_space<vmem>>, %arg7: memref<128x128xbf16, #tpu.memory_space<vmem>>, %arg8: memref<1x128xf32, #tpu.memory_space<vmem>>, %arg9: memref<8x2xf32, #tpu.memory_space<vmem>>) attributes {dimension_semantics = [#tpu.dimension_semantics<parallel>], iteration_bounds = array<i64: 1>, scalar_prefetch = 0 : i64, scratch_operands = 0 : i64, tpu.core_type = #tpu.core_type<tc>, window_params = [{transform_indices = @transform_0, window_bounds = array<i64: 8, 32>}, {transform_indices = @transform_1, window_bounds = array<i64: 8, 32>}, {pipeline_mode = #tpu.pipeline_mode<synchronous>, transform_indices = @transform_2, window_bounds = array<i64: 32, 128>}, {pipeline_mode = #tpu.pipeline_mode<synchronous>, transform_indices = @transform_3, window_bounds = array<i64: 1, 128>}, {pipeline_mode = #tpu.pipeline_mode<synchronous>, transform_indices = @transform_4, window_bounds = array<i64: 128, 128>}, {pipeline_mode = #tpu.pipeline_mode<synchronous>, transform_indices = @transform_5, window_bounds = array<i64: 1, 128>}, {pipeline_mode = #tpu.pipeline_mode<synchronous>, transform_indices = @transform_6, window_bounds = array<i64: 128, 128>}, {pipeline_mode = #tpu.pipeline_mode<synchronous>, transform_indices = @transform_7, window_bounds = array<i64: 1, 128>}, {transform_indices = @transform_8, window_bounds = array<i64: 8, 2>}]} {
    %c0 = arith.constant 0 : index
    %c0_0 = arith.constant 0 : index
    %0 = vector.load %arg2[%c0, %c0_0] : memref<8x32xf32, #tpu.memory_space<vmem>>, vector<8x32xf32>
    %c0_1 = arith.constant 0 : index
    %c0_2 = arith.constant 0 : index
    %1 = vector.load %arg1[%c0_1, %c0_2] : memref<8x32xf32, #tpu.memory_space<vmem>>, vector<8x32xf32>
    %2 = arith.subf %0, %1 : vector<8x32xf32>
    %3 = arith.truncf %2 : vector<8x32xf32> to vector<8x32xbf16>
    %c0_3 = arith.constant 0 : index
    %c0_4 = arith.constant 0 : index
    %4 = vector.load %arg3[%c0_3, %c0_4] : memref<32x128xbf16, #tpu.memory_space<vmem>>, vector<32x128xbf16>
    %cst = arith.constant dense<0.000000e+00> : vector<8x128xf32>
    %5 = tpu.matmul %3, %4, %cst {dimension_numbers = #tpu.dot_dimension_numbers<[1], [0], [0], [1], [0, 0, 1, 1], [], []>} : vector<8x32xbf16>, vector<32x128xbf16>, vector<8x128xf32> -> vector<8x128xf32>
    %c0_5 = arith.constant 0 : index
    %c0_6 = arith.constant 0 : index
    %6 = vector.load %arg4[%c0_5, %c0_6] : memref<1x128xf32, #tpu.memory_space<vmem>>, vector<1x128xf32>
    %7 = vector.broadcast %6 : vector<1x128xf32> to vector<8x128xf32>
    %8 = arith.addf %5, %7 : vector<8x128xf32>
    %cst_7 = arith.constant 0.000000e+00 : f32
    %9 = vector.broadcast %cst_7 : f32 to vector<8x128xf32>
    %10 = arith.maximumf %8, %9 : vector<8x128xf32>
    %11 = arith.truncf %10 : vector<8x128xf32> to vector<8x128xbf16>
    %c0_8 = arith.constant 0 : index
    %c0_9 = arith.constant 0 : index
    %12 = vector.load %arg5[%c0_8, %c0_9] : memref<128x128xbf16, #tpu.memory_space<vmem>>, vector<128x128xbf16>
    %cst_10 = arith.constant dense<0.000000e+00> : vector<8x128xf32>
    %13 = tpu.matmul %11, %12, %cst_10 {dimension_numbers = #tpu.dot_dimension_numbers<[1], [0], [0], [1], [0, 0, 1, 1], [], []>} : vector<8x128xbf16>, vector<128x128xbf16>, vector<8x128xf32> -> vector<8x128xf32>
    %c0_11 = arith.constant 0 : index
    %c0_12 = arith.constant 0 : index
    %14 = vector.load %arg6[%c0_11, %c0_12] : memref<1x128xf32, #tpu.memory_space<vmem>>, vector<1x128xf32>
    %15 = vector.broadcast %14 : vector<1x128xf32> to vector<8x128xf32>
    %16 = arith.addf %13, %15 : vector<8x128xf32>
    %cst_13 = arith.constant 0.000000e+00 : f32
    %17 = vector.broadcast %cst_13 : f32 to vector<8x128xf32>
    %18 = arith.maximumf %16, %17 : vector<8x128xf32>
    %19 = arith.truncf %18 : vector<8x128xf32> to vector<8x128xbf16>
    %c0_14 = arith.constant 0 : index
    %c0_15 = arith.constant 0 : index
    %20 = vector.load %arg7[%c0_14, %c0_15] : memref<128x128xbf16, #tpu.memory_space<vmem>>, vector<128x128xbf16>
    %cst_16 = arith.constant dense<0.000000e+00> : vector<8x128xf32>
    %21 = tpu.matmul %19, %20, %cst_16 {dimension_numbers = #tpu.dot_dimension_numbers<[1], [0], [0], [1], [0, 0, 1, 1], [], []>} : vector<8x128xbf16>, vector<128x128xbf16>, vector<8x128xf32> -> vector<8x128xf32>
    %c0_17 = arith.constant 0 : index
    %c0_18 = arith.constant 0 : index
    %22 = vector.load %arg8[%c0_17, %c0_18] : memref<1x128xf32, #tpu.memory_space<vmem>>, vector<1x128xf32>
    %23 = vector.broadcast %22 : vector<1x128xf32> to vector<8x128xf32>
    %24 = arith.addf %21, %23 : vector<8x128xf32>
    %25 = vector.extract_strided_slice %24 {offsets = [0, 0], sizes = [8, 2], strides = [1, 1]} : vector<8x128xf32> to vector<8x2xf32>
    %c0_19 = arith.constant 0 : index
    %c0_20 = arith.constant 0 : index
    %26 = vector.load %arg9[%c0_19, %c0_20] : memref<8x2xf32, #tpu.memory_space<vmem>>, vector<8x2xf32>
    tpu.vector_store %arg9[%c0_19, %c0_20], %25 {strides = array<i32>} : memref<8x2xf32, #tpu.memory_space<vmem>>, vector<8x2xf32>,
    return
  }
  func.func @transform_0(%arg0: i32) -> (i32, i32) {
    %c0_i32 = arith.constant 0 : i32
    %c0_i32_0 = arith.constant 0 : i32
    return %arg0, %c0_i32 : i32, i32
  }
  func.func @transform_1(%arg0: i32) -> (i32, i32) {
    %c0_i32 = arith.constant 0 : i32
    %c0_i32_0 = arith.constant 0 : i32
    return %arg0, %c0_i32 : i32, i32
  }
  func.func @transform_2(%arg0: i32) -> (i32, i32) {
    %c0_i32 = arith.constant 0 : i32
    %c0_i32_0 = arith.constant 0 : i32
    %c0_i32_1 = arith.constant 0 : i32
    return %c0_i32, %c0_i32_0 : i32, i32
  }
  func.func @transform_3(%arg0: i32) -> (i32, i32) {
    %c0_i32 = arith.constant 0 : i32
    %c0_i32_0 = arith.constant 0 : i32
    %c0_i32_1 = arith.constant 0 : i32
    return %c0_i32, %c0_i32_0 : i32, i32
  }
  func.func @transform_4(%arg0: i32) -> (i32, i32) {
    %c0_i32 = arith.constant 0 : i32
    %c0_i32_0 = arith.constant 0 : i32
    %c0_i32_1 = arith.constant 0 : i32
    return %c0_i32, %c0_i32_0 : i32, i32
  }
  func.func @transform_5(%arg0: i32) -> (i32, i32) {
    %c0_i32 = arith.constant 0 : i32
    %c0_i32_0 = arith.constant 0 : i32
    %c0_i32_1 = arith.constant 0 : i32
    return %c0_i32, %c0_i32_0 : i32, i32
  }
  func.func @transform_6(%arg0: i32) -> (i32, i32) {
    %c0_i32 = arith.constant 0 : i32
    %c0_i32_0 = arith.constant 0 : i32
    %c0_i32_1 = arith.constant 0 : i32
    return %c0_i32, %c0_i32_0 : i32, i32
  }
  func.func @transform_7(%arg0: i32) -> (i32, i32) {
    %c0_i32 = arith.constant 0 : i32
    %c0_i32_0 = arith.constant 0 : i32
    %c0_i32_1 = arith.constant 0 : i32
    return %c0_i32, %c0_i32_0 : i32, i32
  }
  func.func @transform_8(%arg0: i32) -> (i32, i32) {
    %c0_i32 = arith.constant 0 : i32
    %c0_i32_0 = arith.constant 0 : i32
    return %arg0, %c0_i32 : i32, i32
  }
}

</mosaic_0001>

<bundles_post_ra>
// kernel: tpu_custom_call.1
= control target key start
LH: loop header
LB: loop body
LE: loop exit
PB: predicated region body
PF: predicated region fallthrough
CT: control target
= control target key end

     0   :  { %13 = vsyncpa [#allocation3], 0  ;;  %s738_s0 = inlined_call_operand.hbm [shape: f32[8,32], index: 0, kind: input, shape index: {}]   ;;  %s739_s1 = inlined_call_operand.hbm [shape: f32[8,32], index: 1, kind: input, shape index: {}]   ;;  %s740_s2 = inlined_call_operand.hbm [shape: bf16[32,128], index: 2, kind: input, shape index: {}]   ;;  %s741_s3 = inlined_call_operand.vmem [shape: f32[1,128], index: 3, kind: input, shape index: {}]   ;;  %s742_s4 = inlined_call_operand.hbm [shape: bf16[128,128], index: 4, kind: input, shape index: {}]   ;;  %s743_s5 = inlined_call_operand.vmem [shape: f32[1,128], index: 5, kind: input, shape index: {}]   ;;  %s744_s6 = inlined_call_operand.hbm [shape: bf16[128,128], index: 6, kind: input, shape index: {}]   ;;  %s745_s7 = inlined_call_operand.vmem [shape: f32[1,128], index: 7, kind: input, shape index: {}]   ;;  %s746_s8 = inlined_call_operand.vmem [shape: f32[8,2], index: 8, kind: output, shape index: {}]  }
   0x1   :  { %14 = vsyncpa [#allocation5], 0 }
   0x2   :  { %15 = vsyncpa [#allocation8], 0  ;;  %s624_s27 = smov [#allocation4]  }
   0x3   :  { %s32_s28 = sshll.u32 %s624_s27, 4  ;;  %s33_s28 = int_to_ptr.vmem [resolvable:$true] %s32_s28 }
   0x4   :  { %s526_s29 = scalar_lea.vmem %s33_s28, 128  ;;  %p531_p1 = scmp.lt.s32.totalorder %s33_s28, %s33_s28 }
   0x5   :  { %p527_p0 = scmp.ne.s32.totalorder %s33_s28, %s526_s29  ;;  %p532_p2 = scmp.lt.s32.totalorder %s526_s29, %s526_s29 }
   0x7   :  { %p533_p3 = por %p532_p2, %p531_p1 }
   0x9   :  { %p534_p4 = pnand %p533_p3, %p527_p0 }
   0xb   :  { %537 = shalt.err (!%p534_p4)
}
   0xc   :  { %35 = dma.hbm_to_vmem [thread:$0]  %s739_s1, 128, %s33_s28, [#allocation5]  }
   0xd   :  { %s625_s10 = smov [#allocation7]   ;;  %s626_s12 = smov [#allocation2]  }
   0xe   :  { %s55_s11 = sshll.u32 %s625_s10, 4  ;;  %s22_s13 = sshll.u32 %s626_s12, 4  ;;  %s56_s11 = int_to_ptr.vmem [resolvable:$true] %s55_s11  ;;  %s23_s13 = int_to_ptr.vmem [resolvable:$true] %s22_s13 }
   0xf   :  { %s546_s14 = scalar_lea.vmem %s56_s11, 1024  ;;  %p551_p6 = scmp.lt.s32.totalorder %s56_s11, %s56_s11 }
  0x10   :  { %p547_p5 = scmp.ne.s32.totalorder %s56_s11, %s546_s14  ;;  %p552_p7 = scmp.lt.s32.totalorder %s546_s14, %s546_s14 }
  0x12   :  { %p553_p8 = por %p552_p7, %p551_p6 }
  0x14   :  { %p554_p9 = pnand %p553_p8, %p547_p5 }
  0x16   :  { %557 = shalt.err (!%p554_p9)
}
  0x17   :  { %s627_s15 = smov 64   ;;  %s628_s16 = smov 4  }
  0x18   :  { %61 = dma.hbm_to_vmem [thread:$0]  %s742_s4, 1024, %s56_s11, [#allocation8], %s627_s15, %s627_s15, %s628_s16  }
  0x19   :  { %s566_s1 = scalar_lea.vmem %s23_s13, 128  ;;  %p571_p11 = scmp.lt.s32.totalorder %s23_s13, %s23_s13 }
  0x1a   :  { %p567_p10 = scmp.ne.s32.totalorder %s23_s13, %s566_s1  ;;  %p572_p12 = scmp.lt.s32.totalorder %s566_s1, %s566_s1 }
  0x1c   :  { %p573_p13 = por %p572_p12, %p571_p11 }
  0x1e   :  { %p574_p0 = pnand %p573_p13, %p567_p10 }
  0x20   :  { %577 = shalt.err (!%p574_p0)
}
  0x21   :  { %25 = dma.hbm_to_vmem [thread:$0]  %s738_s0, 128, %s23_s13, [#allocation3]  }
  0x22   :  { %s629_s21 = smov [#allocation6]   ;;  %s630_s23 = smov [#allocation9]  }
  0x23   :  { %s41_s22 = sshll.u32 %s629_s21, 4  ;;  %s69_s24 = sshll.u32 %s630_s23, 4  ;;  %s42_s22 = int_to_ptr.vmem [resolvable:$true] %s41_s22  ;;  %s70_s24 = int_to_ptr.vmem [resolvable:$true] %s69_s24 }
  0x24   :  { %s586_s25 = scalar_lea.vmem %s42_s22, 256  ;;  %p591_p2 = scmp.lt.s32.totalorder %s42_s22, %s42_s22 }
  0x25   :  { %p587_p1 = scmp.ne.s32.totalorder %s42_s22, %s586_s25  ;;  %p592_p3 = scmp.lt.s32.totalorder %s586_s25, %s586_s25 }
  0x27   :  { %p593_p4 = por %p592_p3, %p591_p2 }
  0x29   :  { %p594_p5 = pnand %p593_p4, %p587_p1 }
  0x2b   :  { %597 = shalt.err (!%p594_p5)
}
  0x2c   :  { %47 = dma.hbm_to_vmem [thread:$0]  %s740_s2, 256, %s42_s22, [#allocation5], %s627_s15, %s627_s15, %s628_s16  }
  0x2d   :  { %s606_s0 = scalar_lea.vmem %s70_s24, 1024  ;;  %p611_p7 = scmp.lt.s32.totalorder %s70_s24, %s70_s24 }
  0x2e   :  { %p607_p6 = scmp.ne.s32.totalorder %s70_s24, %s606_s0  ;;  %p612_p8 = scmp.lt.s32.totalorder %s606_s0, %s606_s0 }
  0x30   :  { %p613_p9 = por %p612_p8, %p611_p7 }
  0x32   :  { %p614_p10 = pnand %p613_p9, %p607_p6 }
  0x34   :  { %617 = shalt.err (!%p614_p10)
}
  0x35   :  { %75 = dma.hbm_to_vmem [thread:$0]  %s744_s6, 1024, %s70_s24, [#allocation8], %s627_s15, %s627_s15, %s628_s16  }
  0x36   :  { %618 = dma.done.wait [#allocation3], 128  }
  0x37   :  { %619 = vsyncadd [#allocation3], 4294967168 }
  0x38   :  { %620 = dma.done.wait [#allocation5], 384  }
  0x39   :  { %621 = vsyncadd [#allocation5], 4294966912 }
  0x3a   :  { %622 = dma.done.wait [#allocation8], 2048  }
  0x3b   :  { %623 = vsyncadd [#allocation8], 4294965248  ;;  %v631_v0 = vmov 0.0   ;;  %vm632_vm0 = vmmov 0   ;;  %v500_v1 = vld [vmem:[#allocation6 + $0x8] sm:$0xff]   ;;  %v501_v2 = vld [vmem:[#allocation6] sm:$0xff]  }
  0x3c   :  { %443 = vmatprep.subr.bf16.mxu0 %v631_v0  ;;  %447 = vmatprep.mubr.msk.bf16.mxu0 %vm632_vm0, %v631_v0  ;;  %v94_v3 = vld [vmem:[#allocation4] sm:$0xff]  ;;  %v95_v4 = vld [vmem:[#allocation2] sm:$0xff]  ;;  %v502_v6 = vld [vmem:[#allocation7 + $0x38] sm:$0xff]   ;;  %vm121_vm1 = vcmask 261120   ;;  %vm391_vm2 = vcmask 15360  }
  0x3d   :  { %451 = vmatprep.subr.bf16.mxu1 %v631_v0  ;;  %467 = vmatprep.mubr.msk.bf16.mxu1 %vm632_vm0, %v631_v0  ;;  %v96_v5 = vsub.f32 %v94_v3, %v95_v4  ;;  %v503_v8 = vld [vmem:[#allocation7 + $0x30] sm:$0xff]   ;;  %v504_v9 = vld [vmem:[#allocation7 + $0x28] sm:$0xff]   ;;  %v505_v10 = vld [vmem:[#allocation7 + $0x20] sm:$0xff]  }
  0x3e   :  { %444 = vmatpush3.bf16.msra.mxu0 %v500_v1  ;;  %452 = vmatpush3.bf16.msra.mxu1 %v502_v6  ;;  %v506_v11 = vld [vmem:[#allocation7 + $0x18] sm:$0xff]   ;;  %v507_v12 = vld [vmem:[#allocation7 + $0x10] sm:$0xff]   ;;  %v508_v13 = vld [vmem:[#allocation7 + $0x8] sm:$0xff]  }
  0x3f   :  { %445 = vmatprep.subr.bf16.mxu0 %v631_v0  ;;  %v97_v7 = vpack.c.bf16 %v96_v5, %v96_v5  ;;  %453 = vmatprep.subr.bf16.mxu1 %v631_v0  ;;  %v509_v14 = vld [vmem:[#allocation7] sm:$0xff]   ;;  %v510_v15 = vld [vmem:[#allocation9 + $0x38] sm:$0xff]   ;;  %v511_v16 = vld [vmem:[#allocation9 + $0x30] sm:$0xff]  }
  0x40   :  { %v512_v17 = vld [vmem:[#allocation9 + $0x28] sm:$0xff]   ;;  %v513_v18 = vld [vmem:[#allocation9 + $0x20] sm:$0xff]   ;;  %v514_v19 = vld [vmem:[#allocation9 + $0x18] sm:$0xff]  }
  0x41   :  { %v515_v20 = vld [vmem:[#allocation9 + $0x10] sm:$0xff]   ;;  %v400_v21 = vld [vmem:[%s741_s3] ss:$0 sm:$0xff]  ;;  %v516_v29 = vld [vmem:[#allocation9 + $0x8] sm:$0xff]  }
  0x42   :  { %446 = vmatpush3.bf16.msra.mxu0 %v501_v2  ;;  %454 = vmatpush3.bf16.msra.mxu1 %v503_v8  ;;  %v517_v30 = vld [vmem:[#allocation9] sm:$0xff]  }
  0x43   :  { %471 = vmatprep.subr.bf16.mxu0 %v631_v0  ;;  %455 = vmatprep.subr.bf16.mxu1 %v631_v0  ;;  %v404_v31 = vld [vmem:[%s743_s5] ss:$0 sm:$0xff] }
  0x44   :  { %v413_v39 = vld [vmem:[%s745_s7] ss:$0 sm:$0xff] }
  0x45   :  { %448 = vmatmul.mubr.msk.bf16.vlgmr.msra.gmra.mxu0 %vm121_vm1, %v97_v7 }
  0x46   :  { %487 = vmatprep.mubr.msk.bf16.mxu0 %vm632_vm0, %v631_v0  ;;  %456 = vmatpush3.bf16.msra.mxu1 %v504_v9 }
  0x47   :  { %457 = vmatprep.subr.bf16.mxu1 %v631_v0  ;;  %472 = vmatpush3.bf16.msra.mxu0 %v510_v15 }
  0x48   :  { %473 = vmatprep.subr.bf16.mxu0 %v631_v0 }
  0x4a   :  { %458 = vmatpush3.bf16.msra.mxu1 %v505_v10 }
  0x4b   :  { %459 = vmatprep.subr.bf16.mxu1 %v631_v0  ;;  %474 = vmatpush3.bf16.msra.mxu0 %v511_v16 }
  0x4c   :  { %475 = vmatprep.subr.bf16.mxu0 %v631_v0 }
  0x4e   :  { %460 = vmatpush3.bf16.msra.mxu1 %v506_v11 }
  0x4f   :  { %461 = vmatprep.subr.bf16.mxu1 %v631_v0  ;;  %476 = vmatpush3.bf16.msra.mxu0 %v512_v17 }
  0x50   :  { %477 = vmatprep.subr.bf16.mxu0 %v631_v0 }
  0x52   :  { %462 = vmatpush3.bf16.msra.mxu1 %v507_v12 }
  0x53   :  { %463 = vmatprep.subr.bf16.mxu1 %v631_v0  ;;  %478 = vmatpush3.bf16.msra.mxu0 %v513_v18 }
  0x54   :  { %479 = vmatprep.subr.bf16.mxu0 %v631_v0 }
  0x56   :  { %464 = vmatpush3.bf16.msra.mxu1 %v508_v13 }
  0x57   :  { %465 = vmatprep.subr.bf16.mxu1 %v631_v0  ;;  %480 = vmatpush3.bf16.msra.mxu0 %v514_v19 }
  0x58   :  { %481 = vmatprep.subr.bf16.mxu0 %v631_v0 }
  0x5a   :  { %466 = vmatpush3.bf16.msra.mxu1 %v509_v14 }
  0x5b   :  { %482 = vmatpush3.bf16.msra.mxu0 %v515_v20 }
  0x5c   :  { %483 = vmatprep.subr.bf16.mxu0 %v631_v0 }
  0x5f   :  { %484 = vmatpush3.bf16.msra.mxu0 %v516_v29 }
  0x60   :  { %485 = vmatprep.subr.bf16.mxu0 %v631_v0 }
  0x63   :  { %486 = vmatpush3.bf16.msra.mxu0 %v517_v30 }
 0x105   :  { %v159_v22 = vpop.f32.mrf.mxu0 }
 0x106   :  { %v160_v23 = vadd.f32 %v400_v21, %v159_v22 }
 0x107   :  { %v449_v24 = vpop.f32.mrf.mxu0 }
 0x108   :  { %v165_v25 = vmax.f32 %v160_v23, 0.0 }
 0x109   :  { %v162_v26 = vpop.f32.mrf.mxu0 }
 0x10a   :  { %v166_v27 = vpack.c.bf16 %v165_v25, %v165_v25 }
 0x10b   :  { %v450_v28 = vpop.f32.mrf.mxu0 }
 0x10c   :  { %468 = vmatmul.mubr.bf16.vlgmr.msra.gmra.mxu1 %v166_v27 }
 0x1cc   :  { %v272_v32 = vpop.f32.mrf.mxu1 }
 0x1cd   :  { %v273_v33 = vadd.f32 %v404_v31, %v272_v32 }
 0x1ce   :  { %v469_v34 = vpop.f32.mrf.mxu1 }
 0x1cf   :  { %v278_v35 = vmax.f32 %v273_v33, 0.0 }
 0x1d0   :  { %v275_v36 = vpop.f32.mrf.mxu1 }
 0x1d1   :  { %v279_v37 = vpack.c.bf16 %v278_v35, %v278_v35 }
 0x1d2   :  { %v470_v38 = vpop.f32.mrf.mxu1 }
 0x1d3   :  { %488 = vmatmul.mubr.bf16.vlgmr.msra.gmra.mxu0 %v279_v37 }
 0x293   :  { %v385_v40 = vpop.f32.mrf.mxu0 }
 0x294   :  { %v386_v41 = vadd.f32 %v413_v39, %v385_v40 }
 0x295   :  { %v489_v42 = vpop.f32.mrf.mxu0 }
 0x296   :  { %392 = vst.msk [vmem:[%s746_s8] sm:$0xff] %vm391_vm2, %v386_v41 }
 0x297   :  { %v388_v43 = vpop.f32.mrf.mxu0 }
 0x299   :  { %v490_v44 = vpop.f32.mrf.mxu0 }
 0x29a   :  { %397 = vsyncpa [#allocation3], 1 }
 0x29b   :  { %398 = vsyncpa [#allocation5], 1 }
 0x29c   :  { %399 = vsyncpa [#allocation8], 1 }

</bundles_post_ra>
